<compile_context>
chip_gen: v6e
topology: v6e:2x2x1
jax: 0.10.0
libtpu: 0.0.40
codegen_flags: <defaults>
</compile_context>

<pallas_src>
import jax
import jax.numpy as jnp
from jax import lax
from jax.experimental import pallas as pl
from jax.experimental.pallas import tpu as pltpu


# ----------------------------- Pallas kernel --------------------------------

def _make_kernel(H, W, C, Cout, tile_d):
    WC = W * C                      # lane width of the input tile
    WO = W * Cout                   # lane width of every output column group
    RT = tile_d * H                 # rows per tile (d, h flattened)

    def kernel(x_ref, hlo_ref, hhi_ref, w_ref, b_ref, o_ref):
        t = pl.program_id(1)
        nt = pl.num_programs(1)

        x = x_ref[0]                                   # (RT, WC) f32
        xb = x.astype(jnp.bfloat16)
        wp = w_ref[...]                                # (WC, 7*WO) bf16
        bias = b_ref[...]                              # (3, WO)  f32

        # One fused MXU pass over all branch/tap column groups (BN scale folded).
        y = jnp.dot(xb, wp, preferred_element_type=jnp.float32)   # (RT, 7*WO)

        # Halo planes: only the D-branch tap columns (groups 1 and 2) are needed.
        hlo = jnp.dot(hlo_ref[0].astype(jnp.bfloat16), wp[:, 1 * WO:2 * WO],
                      preferred_element_type=jnp.float32)          # (H, WO)
        hhi = jnp.dot(hhi_ref[0].astype(jnp.bfloat16), wp[:, 2 * WO:3 * WO],
                      preferred_element_type=jnp.float32)          # (H, WO)
        hlo = jnp.where(t > 0, hlo, 0.0)       # zero padding at the volume edge
        hhi = jnp.where(t < nt - 1, hhi, 0.0)

        def grp(i):                                    # lane-aligned static slice
            return y[:, i * WO:(i + 1) * WO]

        def sigmoid(v):                                # one EUP push per element
            return 0.5 * jnp.tanh(0.5 * v) + 0.5

        # --- branch 0: conv3x1x1 (along D) — ±H row shift via halo splice -----
        z0, z2 = grp(1), grp(2)
        if tile_d > 1:                                 # 8-aligned static slices
            z0s = jnp.concatenate([hlo, z0[:RT - H]], axis=0)   # neighbor d-1
            z2s = jnp.concatenate([z2[H:], hhi], axis=0)        # neighbor d+1
        else:
            z0s, z2s = hlo, hhi
        g = sigmoid(grp(0) + z0s + z2s + bias[0:1, :])

        # --- branch 1: conv1x3x1 (along H) — ±1 sublane roll (XLU) + edge mask -
        h_idx = lax.broadcasted_iota(jnp.int32, (RT, 1), 0) % H
        z0s = jnp.where(h_idx >= 1, pltpu.roll(grp(4), 1, axis=0), 0.0)
        z2s = jnp.where(h_idx <= H - 2, pltpu.roll(grp(5), RT - 1, axis=0), 0.0)
        g = g + sigmoid(grp(3) + z0s + z2s + bias[1:2, :])

        # --- branch 2: conv1x1x3 (along W) — block-tridiagonal matmul, done ----
        g = g + sigmoid(grp(6) + bias[2:3, :])

        o_ref[0] = (g * x).astype(o_ref.dtype)

    return kernel


# --------------------------- host-side packing --------------------------------

def _pack_params(w1, w2, w3, s1, s2, s3, b1, b2, b3, W, C, Cout, mm_dtype):
    """Fold BN scale into the conv taps and pack the lane-dense weight matrix.

    Column groups (each W*Cout wide):
      0: D center   1: D tap(d-1)   2: D tap(d+1)
      3: H center   4: H tap(h-1)   5: H tap(h+1)
      6: whole W branch as a block-tridiagonal (W*C, W*Cout) matrix
    """
    eye = jnp.eye(W, dtype=jnp.float32)

    def bdiag(a):                                  # (C,Cout) -> (W*C, W*Cout)
        return jnp.kron(eye, a)

    wd = w1 * s1.reshape(1, 1, Cout)               # conv3x1x1 + bn0
    wh = w2 * s2.reshape(1, 1, Cout)               # conv1x3x1 + bn0_2
    ww = w3 * s3.reshape(1, 1, Cout)               # conv1x1x3 + bn0_3
    # tap t reads input at w_out + t - 1  ->  block on diagonal k = 1 - t
    wtri = sum(jnp.kron(jnp.eye(W, k=1 - t, dtype=jnp.float32), ww[t])
               for t in range(3))

    wpack = jnp.concatenate(
        [bdiag(wd[1]), bdiag(wd[0]), bdiag(wd[2]),
         bdiag(wh[1]), bdiag(wh[0]), bdiag(wh[2]), wtri],
        axis=1).astype(mm_dtype)                   # (W*C, 7*W*Cout)

    bpack = jnp.concatenate(
        [jnp.tile(b1.reshape(1, Cout), (1, W)),
         jnp.tile(b2.reshape(1, Cout), (1, W)),
         jnp.tile(b3.reshape(1, Cout), (1, W))],
        axis=0).astype(jnp.float32)                # (3, W*Cout)
    return wpack, bpack


def _vmem_limit_bytes():
    # ~3/4 of physical VMEM per generation (v7x: ~48 MiB, v5e/v6e: ~96 MiB),
    # leaving headroom for compiler scratch and double buffers.
    try:
        cap = pltpu.get_tpu_info().vmem_capacity_bytes
    except Exception:
        cap = 64 * 1024 * 1024
    return int(cap * 3 // 4)


# ------------------------------- entry point ----------------------------------

def recon_block(x, w1, w2, w3, s1, b1, s2, b2, s3, b3, *, tile_d=None):
    B, D, H, W, C = x.shape
    Cout = w1.shape[-1]
    assert C == Cout, "ReconBlock requires in_filters == out_filters"
    assert H % 8 == 0, "H must be a multiple of 8 (sublane-aligned D planes)"
    if tile_d is None:
        tile_d = D
    assert D % tile_d == 0, "tile_d must divide D"
    NT = D // tile_d
    WC = W * C
    RT = tile_d * H

    # Lane-dense view: rows = (d, h), lanes = (w, c).  Pure reshape, no copy.
    x_ld = x.reshape(B, D * H, WC)
    wpack, bpack = _pack_params(w1, w2, w3, s1, s2, s3, b1, b2, b3,
                                W, C, Cout, jnp.bfloat16)

    kernel = _make_kernel(H, W, C, Cout, tile_d)

    itemsize = x.dtype.itemsize
    cost = pl.CostEstimate(
        flops=int(2 * B * D * H * W * C * 9 * Cout),
        transcendentals=int(3 * B * D * H * W * Cout),
        bytes_accessed=int(2 * x.size * itemsize              # read x + write out
                           + 2 * B * NT * H * WC * itemsize   # halo re-reads
                           + wpack.size * 2 + bpack.size * 4))

    out = pl.pallas_call(
        kernel,
        out_shape=jax.ShapeDtypeStruct((B, D * H, WC), x.dtype),
        grid=(B, NT),
        in_specs=[
            # main tile: tile_d planes, no halo
            pl.BlockSpec((1, RT, WC), lambda b, t: (b, t, 0)),
            # one-plane halos (clamped at the edges; masked in-kernel)
            pl.BlockSpec((1, H, WC),
                         lambda b, t: (b, jnp.maximum(t * tile_d - 1, 0), 0)),
            pl.BlockSpec((1, H, WC),
                         lambda b, t: (b, jnp.minimum((t + 1) * tile_d, D - 1), 0)),
            pl.BlockSpec((WC, 7 * WC), lambda b, t: (0, 0)),
            pl.BlockSpec((3, WC), lambda b, t: (0, 0)),
        ],
        out_specs=pl.BlockSpec((1, RT, WC), lambda b, t: (b, t, 0)),
        compiler_params=pltpu.CompilerParams(
            dimension_semantics=("parallel", "parallel"),
            vmem_limit_bytes=_vmem_limit_bytes()),
        cost_estimate=cost,
    )(x_ld, x_ld, x_ld, wpack, bpack)
    return out.reshape(B, D, H, W, Cout)


# --------------------------- pure-JAX reference ------------------------------

def _conv_along(x, w, axis):
    """x: (B,D,H,W,C); w: (3,Cin,Cout); 3-tap conv (cross-corr) along spatial axis."""
    xt = jnp.transpose(x, (0, 4, 1, 2, 3))                 # NCDHW
    kshape = [1, 1, 1]
    kshape[axis] = 3
    wt = jnp.transpose(w, (2, 1, 0)).reshape(w.shape[2], w.shape[1], *kshape)
    pad = [(0, 0), (0, 0), (0, 0)]
    pad[axis] = (1, 1)
    y = lax.conv_general_dilated(xt, wt, window_strides=(1, 1, 1), padding=pad,
                                 dimension_numbers=('NCDHW', 'OIDHW', 'NCDHW'),
                                 precision=lax.Precision.HIGHEST)
    return jnp.transpose(y, (0, 2, 3, 4, 1))


def recon_block_ref(x, w1, w2, w3, s1, b1, s2, b2, s3, b3):
    def gate(w, s, bb, axis):
        y = _conv_along(x, w, axis)
        y = y * s.reshape(1, 1, 1, 1, -1) + bb.reshape(1, 1, 1, 1, -1)
        return jax.nn.sigmoid(y)
    g = gate(w1, s1, b1, 0) + gate(w2, s2, b2, 1) + gate(w3, s3, b3, 2)
    return g * x


# ------------------------------------ main ------------------------------------

if __name__ == "__main__":
    key = jax.random.PRNGKey(0)
    # in_filters must equal out_filters (forward multiplies the result by x.features).
    B, D, H, W, C = 2, 4, 8, 16, 8          # W*C = 128 -> fully lane-dense tiles
    Cout = C
    ks = jax.random.split(key, 8)

    x = jax.random.normal(ks[0], (B, D, H, W, C), jnp.float32)
    w1 = 0.3 * jax.random.normal(ks[1], (3, C, Cout), jnp.float32)  # conv3x1x1 (D)
    w2 = 0.3 * jax.random.normal(ks[2], (3, C, Cout), jnp.float32)  # conv1x3x1 (H)
    w3 = 0.3 * jax.random.normal(ks[3], (3, C, Cout), jnp.float32)  # conv1x1x3 (W)

    def bn_params(k):
        kg, kb, km, kv = jax.random.split(k, 4)
        gamma = 1.0 + 0.1 * jax.random.normal(kg, (Cout,), jnp.float32)
        beta = 0.1 * jax.random.normal(kb, (Cout,), jnp.float32)
        mean = 0.1 * jax.random.normal(km, (Cout,), jnp.float32)
        var = jnp.abs(jax.random.normal(kv, (Cout,), jnp.float32)) + 0.5
        eps = 1e-5
        scale = gamma / jnp.sqrt(var + eps)
        bias = beta - mean * scale
        return scale.reshape(1, Cout), bias.reshape(1, Cout)

    s1, b1 = bn_params(ks[4])
    s2, b2 = bn_params(ks[5])
    s3, b3 = bn_params(ks[6])

    # tile_d=2 -> grid (B, D/2) = (2, 2): 4 parallel steps (pipelining / 2 TCs on v7x).
    out = recon_block(x, w1, w2, w3, s1, b1, s2, b2, s3, b3, tile_d=2)
    out = jax.block_until_ready(out)

    ref = recon_block_ref(x, w1, w2, w3, s1, b1, s2, b2, s3, b3)
    assert out.shape == ref.shape and out.dtype == ref.dtype
    assert jnp.allclose(out, ref, rtol=2e-2, atol=2e-2), (
        float(jnp.max(jnp.abs(out - ref))))
    print("KERNEL_OK")
</pallas_src>

<mosaic_0001>
module attributes {stable_mosaic.version = 11 : i64} {
  func.func @kernel(%arg0: i32, %arg1: i32, %arg2: memref<1x16x128xf32, #tpu.memory_space<vmem>>, %arg3: memref<1x8x128xf32, #tpu.memory_space<vmem>>, %arg4: memref<1x8x128xf32, #tpu.memory_space<vmem>>, %arg5: memref<128x896xbf16, #tpu.memory_space<vmem>>, %arg6: memref<3x128xf32, #tpu.memory_space<vmem>>, %arg7: memref<1x16x128xf32, #tpu.memory_space<vmem>>) attributes {dimension_semantics = [#tpu.dimension_semantics<parallel>, #tpu.dimension_semantics<parallel>], iteration_bounds = array<i64: 2, 2>, scalar_prefetch = 0 : i64, scratch_operands = 0 : i64, tpu.core_type = #tpu.core_type<tc>, window_params = [{transform_indices = @transform_0, window_bounds = array<i64: 1, 16, 128>}, {transform_indices = @transform_1, window_bounds = array<i64: 1, 8, 128>}, {transform_indices = @transform_2, window_bounds = array<i64: 1, 8, 128>}, {pipeline_mode = #tpu.pipeline_mode<synchronous>, transform_indices = @transform_3, window_bounds = array<i64: 128, 896>}, {pipeline_mode = #tpu.pipeline_mode<synchronous>, transform_indices = @transform_4, window_bounds = array<i64: 3, 128>}, {transform_indices = @transform_5, window_bounds = array<i64: 1, 16, 128>}]} {
    %c0 = arith.constant 0 : index
    %c0_0 = arith.constant 0 : index
    %c0_1 = arith.constant 0 : index
    %0 = vector.load %arg2[%c0, %c0_0, %c0_1] : memref<1x16x128xf32, #tpu.memory_space<vmem>>, vector<1x16x128xf32>
    %1 = vector.shape_cast %0 : vector<1x16x128xf32> to vector<16x128xf32>
    %2 = arith.truncf %1 : vector<16x128xf32> to vector<16x128xbf16>
    %c0_2 = arith.constant 0 : index
    %c0_3 = arith.constant 0 : index
    %3 = vector.load %arg5[%c0_2, %c0_3] : memref<128x896xbf16, #tpu.memory_space<vmem>>, vector<128x896xbf16>
    %c0_4 = arith.constant 0 : index
    %c0_5 = arith.constant 0 : index
    %4 = vector.load %arg6[%c0_4, %c0_5] : memref<3x128xf32, #tpu.memory_space<vmem>>, vector<3x128xf32>
    %cst = arith.constant dense<0.000000e+00> : vector<16x896xf32>
    %5 = tpu.matmul %2, %3, %cst {dimension_numbers = #tpu.dot_dimension_numbers<[1], [0], [0], [1], [0, 0, 1, 1], [], []>} : vector<16x128xbf16>, vector<128x896xbf16>, vector<16x896xf32> -> vector<16x896xf32>
    %c0_6 = arith.constant 0 : index
    %c0_7 = arith.constant 0 : index
    %c0_8 = arith.constant 0 : index
    %6 = vector.load %arg3[%c0_6, %c0_7, %c0_8] : memref<1x8x128xf32, #tpu.memory_space<vmem>>, vector<1x8x128xf32>
    %7 = vector.shape_cast %6 : vector<1x8x128xf32> to vector<8x128xf32>
    %8 = arith.truncf %7 : vector<8x128xf32> to vector<8x128xbf16>
    %9 = vector.extract_strided_slice %3 {offsets = [0, 128], sizes = [128, 128], strides = [1, 1]} : vector<128x896xbf16> to vector<128x128xbf16>
    %cst_9 = arith.constant dense<0.000000e+00> : vector<8x128xf32>
    %10 = tpu.matmul %8, %9, %cst_9 {dimension_numbers = #tpu.dot_dimension_numbers<[1], [0], [0], [1], [0, 0, 1, 1], [], []>} : vector<8x128xbf16>, vector<128x128xbf16>, vector<8x128xf32> -> vector<8x128xf32>
    %c0_10 = arith.constant 0 : index
    %c0_11 = arith.constant 0 : index
    %c0_12 = arith.constant 0 : index
    %11 = vector.load %arg4[%c0_10, %c0_11, %c0_12] : memref<1x8x128xf32, #tpu.memory_space<vmem>>, vector<1x8x128xf32>
    %12 = vector.shape_cast %11 : vector<1x8x128xf32> to vector<8x128xf32>
    %13 = arith.truncf %12 : vector<8x128xf32> to vector<8x128xbf16>
    %14 = vector.extract_strided_slice %3 {offsets = [0, 256], sizes = [128, 128], strides = [1, 1]} : vector<128x896xbf16> to vector<128x128xbf16>
    %cst_13 = arith.constant dense<0.000000e+00> : vector<8x128xf32>
    %15 = tpu.matmul %13, %14, %cst_13 {dimension_numbers = #tpu.dot_dimension_numbers<[1], [0], [0], [1], [0, 0, 1, 1], [], []>} : vector<8x128xbf16>, vector<128x128xbf16>, vector<8x128xf32> -> vector<8x128xf32>
    %c0_i32 = arith.constant 0 : i32
    %16 = arith.cmpi sgt, %arg1, %c0_i32 : i32
    %cst_14 = arith.constant 0.000000e+00 : f32
    %17 = vector.broadcast %cst_14 : f32 to vector<8x128xf32>
    %18 = arith.select %16, %10, %17 : vector<8x128xf32>
    %c1_i32 = arith.constant 1 : i32
    %19 = arith.cmpi slt, %arg1, %c1_i32 : i32
    %cst_15 = arith.constant 0.000000e+00 : f32
    %20 = vector.broadcast %cst_15 : f32 to vector<8x128xf32>
    %21 = arith.select %19, %15, %20 : vector<8x128xf32>
    %22 = vector.extract_strided_slice %5 {offsets = [0, 128], sizes = [16, 128], strides = [1, 1]} : vector<16x896xf32> to vector<16x128xf32>
    %23 = vector.extract_strided_slice %5 {offsets = [0, 256], sizes = [16, 128], strides = [1, 1]} : vector<16x896xf32> to vector<16x128xf32>
    %24 = vector.extract_strided_slice %22 {offsets = [0, 0], sizes = [8, 128], strides = [1, 1]} : vector<16x128xf32> to vector<8x128xf32>
    %25 = tpu.concatenate %18, %24 in 0 : vector<8x128xf32>, vector<8x128xf32> -> vector<16x128xf32>
    %26 = vector.extract_strided_slice %23 {offsets = [8, 0], sizes = [8, 128], strides = [1, 1]} : vector<16x128xf32> to vector<8x128xf32>
    %27 = tpu.concatenate %26, %21 in 0 : vector<8x128xf32>, vector<8x128xf32> -> vector<16x128xf32>
    %28 = vector.extract_strided_slice %5 {offsets = [0, 0], sizes = [16, 128], strides = [1, 1]} : vector<16x896xf32> to vector<16x128xf32>
    %29 = arith.addf %28, %25 : vector<16x128xf32>
    %30 = arith.addf %29, %27 : vector<16x128xf32>
    %31 = vector.extract_strided_slice %4 {offsets = [0, 0], sizes = [1, 128], strides = [1, 1]} : vector<3x128xf32> to vector<1x128xf32>
    %32 = vector.broadcast %31 : vector<1x128xf32> to vector<16x128xf32>
    %33 = arith.addf %30, %32 : vector<16x128xf32>
    %cst_16 = arith.constant 5.000000e-01 : f32
    %34 = vector.broadcast %cst_16 : f32 to vector<16x128xf32>
    %35 = arith.mulf %34, %33 : vector<16x128xf32>
    %36 = math.tanh %35 : vector<16x128xf32>
    %cst_17 = arith.constant 5.000000e-01 : f32
    %37 = vector.broadcast %cst_17 : f32 to vector<16x128xf32>
    %38 = arith.mulf %37, %36 : vector<16x128xf32>
    %cst_18 = arith.constant 5.000000e-01 : f32
    %39 = vector.broadcast %cst_18 : f32 to vector<16x128xf32>
    %40 = arith.addf %38, %39 : vector<16x128xf32>
    %41 = tpu.iota {dimensions = array<i32: 0>} : vector<16x1xi32>
    %c8_i32 = arith.constant 8 : i32
    %c0_i32_19 = arith.constant 0 : i32
    %42 = arith.cmpi eq, %c8_i32, %c0_i32_19 : i32
    %c1_i32_20 = arith.constant 1 : i32
    %43 = arith.select %42, %c1_i32_20, %c8_i32 : i32
    %44 = vector.broadcast %43 : i32 to vector<16x1xi32>
    %45 = arith.remsi %41, %44 : vector<16x1xi32>
    %c0_i32_21 = arith.constant 0 : i32
    %46 = vector.broadcast %c0_i32_21 : i32 to vector<16x1xi32>
    %47 = arith.cmpi ne, %45, %46 : vector<16x1xi32>
    %c0_i32_22 = arith.constant 0 : i32
    %48 = vector.broadcast %c0_i32_22 : i32 to vector<16x1xi32>
    %49 = arith.cmpi slt, %45, %48 : vector<16x1xi32>
    %c0_i32_23 = arith.constant 0 : i32
    %50 = arith.cmpi slt, %43, %c0_i32_23 : i32
    %51 = vector.broadcast %50 : i1 to vector<16x1xi1>
    %52 = vector.broadcast %51 : vector<16x1xi1> to vector<16x1xi1>
    %53 = arith.xori %49, %52 : vector<16x1xi1>
    %54 = arith.andi %53, %47 : vector<16x1xi1>
    %55 = vector.broadcast %43 : i32 to vector<16x1xi32>
    %56 = arith.addi %45, %55 : vector<16x1xi32>
    %57 = arith.select %54, %56, %45 : vector<16x1xi1>, vector<16x1xi32>
    %c1_i32_24 = arith.constant 1 : i32
    %58 = vector.broadcast %c1_i32_24 : i32 to vector<16x1xi32>
    %59 = arith.cmpi sge, %57, %58 : vector<16x1xi32>
    %60 = vector.extract_strided_slice %5 {offsets = [0, 512], sizes = [16, 128], strides = [1, 1]} : vector<16x896xf32> to vector<16x128xf32>
    %c1_i32_25 = arith.constant 1 : i32
    %61 = tpu.dynamic_rotate %60 by %c1_i32_25 dim 0 : vector<16x128xf32>, i32 -> vector<16x128xf32>
    %cst_26 = arith.constant 0.000000e+00 : f32
    %62 = vector.shape_cast %59 : vector<16x1xi1> to vector<16x1xi1>
    %63 = vector.broadcast %62 : vector<16x1xi1> to vector<16x128xi1>
    %64 = vector.broadcast %cst_26 : f32 to vector<16x128xf32>
    %65 = arith.select %63, %61, %64 : vector<16x128xi1>, vector<16x128xf32>
    %c6_i32 = arith.constant 6 : i32
    %66 = vector.broadcast %c6_i32 : i32 to vector<16x1xi32>
    %67 = arith.cmpi sle, %57, %66 : vector<16x1xi32>
    %68 = vector.extract_strided_slice %5 {offsets = [0, 640], sizes = [16, 128], strides = [1, 1]} : vector<16x896xf32> to vector<16x128xf32>
    %c15_i32 = arith.constant 15 : i32
    %69 = tpu.dynamic_rotate %68 by %c15_i32 dim 0 : vector<16x128xf32>, i32 -> vector<16x128xf32>
    %cst_27 = arith.constant 0.000000e+00 : f32
    %70 = vector.shape_cast %67 : vector<16x1xi1> to vector<16x1xi1>
    %71 = vector.broadcast %70 : vector<16x1xi1> to vector<16x128xi1>
    %72 = vector.broadcast %cst_27 : f32 to vector<16x128xf32>
    %73 = arith.select %71, %69, %72 : vector<16x128xi1>, vector<16x128xf32>
    %74 = vector.extract_strided_slice %5 {offsets = [0, 384], sizes = [16, 128], strides = [1, 1]} : vector<16x896xf32> to vector<16x128xf32>
    %75 = arith.addf %74, %65 : vector<16x128xf32>
    %76 = arith.addf %75, %73 : vector<16x128xf32>
    %77 = vector.extract_strided_slice %4 {offsets = [1, 0], sizes = [1, 128], strides = [1, 1]} : vector<3x128xf32> to vector<1x128xf32>
    %78 = vector.broadcast %77 : vector<1x128xf32> to vector<16x128xf32>
    %79 = arith.addf %76, %78 : vector<16x128xf32>
    %cst_28 = arith.constant 5.000000e-01 : f32
    %80 = vector.broadcast %cst_28 : f32 to vector<16x128xf32>
    %81 = arith.mulf %80, %79 : vector<16x128xf32>
    %82 = math.tanh %81 : vector<16x128xf32>
    %cst_29 = arith.constant 5.000000e-01 : f32
    %83 = vector.broadcast %cst_29 : f32 to vector<16x128xf32>
    %84 = arith.mulf %83, %82 : vector<16x128xf32>
    %cst_30 = arith.constant 5.000000e-01 : f32
    %85 = vector.broadcast %cst_30 : f32 to vector<16x128xf32>
    %86 = arith.addf %84, %85 : vector<16x128xf32>
    %87 = arith.addf %40, %86 : vector<16x128xf32>
    %88 = vector.extract_strided_slice %5 {offsets = [0, 768], sizes = [16, 128], strides = [1, 1]} : vector<16x896xf32> to vector<16x128xf32>
    %89 = vector.extract_strided_slice %4 {offsets = [2, 0], sizes = [1, 128], strides = [1, 1]} : vector<3x128xf32> to vector<1x128xf32>
    %90 = vector.broadcast %89 : vector<1x128xf32> to vector<16x128xf32>
    %91 = arith.addf %88, %90 : vector<16x128xf32>
    %cst_31 = arith.constant 5.000000e-01 : f32
    %92 = vector.broadcast %cst_31 : f32 to vector<16x128xf32>
    %93 = arith.mulf %92, %91 : vector<16x128xf32>
    %94 = math.tanh %93 : vector<16x128xf32>
    %cst_32 = arith.constant 5.000000e-01 : f32
    %95 = vector.broadcast %cst_32 : f32 to vector<16x128xf32>
    %96 = arith.mulf %95, %94 : vector<16x128xf32>
    %cst_33 = arith.constant 5.000000e-01 : f32
    %97 = vector.broadcast %cst_33 : f32 to vector<16x128xf32>
    %98 = arith.addf %96, %97 : vector<16x128xf32>
    %99 = arith.addf %87, %98 : vector<16x128xf32>
    %100 = arith.mulf %99, %1 : vector<16x128xf32>
    %c0_34 = arith.constant 0 : index
    %c0_35 = arith.constant 0 : index
    %c0_36 = arith.constant 0 : index
    %101 = vector.load %arg7[%c0_34, %c0_35, %c0_36] : memref<1x16x128xf32, #tpu.memory_space<vmem>>, vector<1x16x128xf32>
    %102 = vector.shape_cast %101 : vector<1x16x128xf32> to vector<16x128xf32>
    %103 = vector.shape_cast %100 : vector<16x128xf32> to vector<1x16x128xf32>
    tpu.vector_store %arg7[%c0_34, %c0_35, %c0_36], %103 {strides = array<i32>} : memref<1x16x128xf32, #tpu.memory_space<vmem>>, vector<1x16x128xf32>,
    return
  }
  func.func @transform_0(%arg0: i32, %arg1: i32) -> (i32, i32, i32) {
    %c0_i32 = arith.constant 0 : i32
    %c0_i32_0 = arith.constant 0 : i32
    return %arg0, %arg1, %c0_i32 : i32, i32, i32
  }
  func.func @transform_1(%arg0: i32, %arg1: i32) -> (i32, i32, i32) {
    %c2_i32 = arith.constant 2 : i32
    %0 = arith.muli %arg1, %c2_i32 : i32
    %c1_i32 = arith.constant 1 : i32
    %1 = arith.subi %0, %c1_i32 : i32
    %c0_i32 = arith.constant 0 : i32
    %2 = arith.maxsi %1, %c0_i32 : i32
    %c0_i32_0 = arith.constant 0 : i32
    %c0_i32_1 = arith.constant 0 : i32
    return %arg0, %2, %c0_i32_0 : i32, i32, i32
  }
  func.func @transform_2(%arg0: i32, %arg1: i32) -> (i32, i32, i32) {
    %c1_i32 = arith.constant 1 : i32
    %0 = arith.addi %arg1, %c1_i32 : i32
    %c2_i32 = arith.constant 2 : i32
    %1 = arith.muli %0, %c2_i32 : i32
    %c3_i32 = arith.constant 3 : i32
    %2 = arith.minsi %1, %c3_i32 : i32
    %c0_i32 = arith.constant 0 : i32
    %c0_i32_0 = arith.constant 0 : i32
    return %arg0, %2, %c0_i32 : i32, i32, i32
  }
  func.func @transform_3(%arg0: i32, %arg1: i32) -> (i32, i32) {
    %c0_i32 = arith.constant 0 : i32
    %c0_i32_0 = arith.constant 0 : i32
    %c0_i32_1 = arith.constant 0 : i32
    return %c0_i32, %c0_i32_0 : i32, i32
  }
  func.func @transform_4(%arg0: i32, %arg1: i32) -> (i32, i32) {
    %c0_i32 = arith.constant 0 : i32
    %c0_i32_0 = arith.constant 0 : i32
    %c0_i32_1 = arith.constant 0 : i32
    return %c0_i32, %c0_i32_0 : i32, i32
  }
  func.func @transform_5(%arg0: i32, %arg1: i32) -> (i32, i32, i32) {
    %c0_i32 = arith.constant 0 : i32
    %c0_i32_0 = arith.constant 0 : i32
    return %arg0, %arg1, %c0_i32 : i32, i32, i32
  }
}

</mosaic_0001>

<bundles_post_ra>
// kernel: tpu_custom_call.1
= control target key start
LH: loop header
LB: loop body
LE: loop exit
PB: predicated region body
PF: predicated region fallthrough
CT: control target
= control target key end

     0   :  { %s2540_s0 = inlined_call_operand.hbm [shape: f32[2,32,128], index: 0, kind: input, shape index: {}]   ;;  %s2541_s1 = inlined_call_operand.hbm [shape: f32[2,32,128], index: 1, kind: input, shape index: {}]   ;;  %s2542_s2 = inlined_call_operand.hbm [shape: f32[2,32,128], index: 2, kind: input, shape index: {}]   ;;  %s2543_s3 = inlined_call_operand.hbm [shape: bf16[128,896], index: 3, kind: input, shape index: {}]   ;;  %s2544_s4 = inlined_call_operand.vmem [shape: f32[3,128], index: 4, kind: input, shape index: {}]   ;;  %s2545_s5 = inlined_call_operand.hbm [shape: f32[2,32,128], index: 5, kind: output, shape index: {}]  }
   0x1   :  { %2562 = sst [smem:[#allocation28_spill]] %s2540_s0 }
   0x2   :  { %2563 = sst [smem:[#allocation29_spill]] %s2541_s1 }
   0x3   :  { %2564 = sst [smem:[#allocation30_spill]] %s2542_s2 }
   0x4   :  { %2565 = sst [smem:[#allocation31_spill]] %s2543_s3 }
   0x5   :  { %2566 = sst [smem:[#allocation32_spill]] %s2544_s4 }
   0x6   :  { %2567 = sst [smem:[#allocation33_spill]] %s2545_s5 }
   0x7   :  { %10 = vsyncpa [#allocation3], 0 }
   0x8   :  { %12 = vsyncpa [#allocation3 + $0x1], 0 }
   0x9   :  { %13 = vsyncpa [#allocation6], 0 }
   0xa   :  { %15 = vsyncpa [#allocation6 + $0x1], 0 }
   0xb   :  { %16 = vsyncpa [#allocation9], 0 }
   0xc   :  { %17 = vsyncpa [#allocation4], 0 }
   0xd   :  { %19 = vsyncpa [#allocation4 + $0x1], 0  ;;  %s2027_s18 = smov 0   ;;  %s2029_s19 = smov 0  }
   0xe   :  { %s2031_s20 = smov 0   ;;  %s2033_s21 = smov 0  }
   0xf   :  { %s2035_s22 = smov 0   ;;  %s2037_s23 = smov 0  }
  0x10   :  { %s2039_s24 = smov 0   ;;  %s2041_s25 = smov 0  }
  0x11   :  { %s2043_s26 = smov 0   ;;  %s2045_s27 = smov 0  }
  0x12   :  { %s2047_s28 = smov 0   ;;  %s2049_s29 = smov 0  }
  0x13   :  { %s2051_s30 = smov 0   ;;  %s2053_s6 = smov 0  }
  0x14 LB: > { %2568 = sst [smem:[#allocation16_spill]] %s1929_s18  ;;  %s2098_s7 = sadd.s32 4294967295, %s1981_s6   ;;  %s1981_s6 = sphi %s2053_s6, %s25_s6   ;;  %s1977_s30 = sphi %s2051_s30, %s2625_s30   ;;  %s1973_s29 = sphi %s2049_s29, %s2624_s29   ;;  %s1969_s28 = sphi %s2047_s28, %s2623_s28   ;;  %s1965_s27 = sphi %s2045_s27, %s2622_s27   ;;  %s1961_s26 = sphi %s2043_s26, %s2621_s26   ;;  %s1957_s25 = sphi %s2041_s25, %s2633_s25   ;;  %s1953_s24 = sphi %s2039_s24, %s2632_s24   ;;  %s1949_s23 = sphi %s2037_s23, %s2631_s23   ;;  %s1945_s22 = sphi %s2035_s22, %s2630_s22   ;;  %s1941_s21 = sphi %s2033_s21, %s2629_s21   ;;  %s1937_s20 = sphi %s2031_s20, %s2628_s20   ;;  %s1933_s19 = sphi %s2029_s19, %s2627_s19   ;;  %s1929_s18 = sphi %s2027_s18, %s2626_s18  }
  0x15   : > { %2569 = sst [smem:[#allocation17_spill]] %s1945_s22  ;;  %s34_s8 = sadd.s32 1, %s1973_s29 }
  0x16   : > { %2570 = sst [smem:[#allocation18_spill]] %s1961_s26  ;;  %p35_p0 = scmp.ge.s32.totalorder %s34_s8, 2 }
  0x17   : > { %2571 = sst [smem:[#allocation19_spill]] %s1965_s27  ;;  %s37_s9 = sadd.s32 1, %s1977_s30 }
  0x18   : > { %2572 = sst [smem:[#allocation20_spill]] %s1969_s28  ;;  %p2557_p1 = scmp.eq.s32.totalorder %s1981_s6, 0 }
  0x19   : > { %2573 = sst [smem:[#allocation21_spill]] %s1973_s29  ;;  %p2558_p2 = scmp.eq.s32.totalorder %s2098_s7, 0 }
  0x1a   : > { %2574 = sst [smem:[#allocation22_spill]] %s1977_s30  ;;  %s2635_s8 = smov (%p35_p0, %s34_s8), 0 }
  0x1b   : > { %2575 = sst [smem:[#allocation23_spill]] %s2635_s8  ;;  %s2637_s9 = smov (!%p35_p0, %s37_s9), %s1977_s30 }
  0x1c   : > { %s42_s10 = ssub.s32 %s1973_s29, %s2635_s8  ;;  %s2110_s11 = sshll.u32 %s1973_s29, 1 }
  0x1d   : > { %p39_p3 = scmp.ge.s32.totalorder %s2637_s9, 2  ;;  %s1285_s12 = sadd.s32 4294967295, %s2110_s11 }
  0x1e   : > { %p71_p4 = scmp.gt.s32.totalorder %s1285_s12, 0  ;;  %s1286_s13 = sshll.u32 %s2635_s8, 1 }
  0x1f   : > { %s2639_s9 = smov (%p39_p3, %s2637_s9), 0  ;;  %s1287_s15 = sadd.s32 4294967295, %s1286_s13 }
  0x20   : > { %2576 = sst [smem:[#allocation24_spill]] %s2639_s9  ;;  %s2641_s12 = smov (!%p71_p4, %s1285_s12), 0 }
  0x21   : > { %s2118_s14 = ssub.s32 %s1977_s30, %s2639_s9  ;;  %p75_p5 = scmp.gt.s32.totalorder %s1287_s15, 0 }
  0x22   : > { %2577 = sst [smem:[#allocation25_spill]] %s2118_s14  ;;  %s2121_s16 = sor.u32 %s42_s10, %s2118_s14 }
  0x23   : > { %p44_p6 = scmp.eq.s32.totalorder %s2121_s16, 0  ;;  %s82_s17 = sadd.s32 1, %s1949_s23 }
  0x24   : > { %s2643_s15 = smov (!%p75_p5, %s1287_s15), 0  ;;  %p89_p7 = scmp.ne.s32.totalorder %s1949_s23, %s1945_s22 }
  0x25   : > { %p95_p8 = scmp.ne.s32.totalorder %s1945_s22, %s1941_s21  ;;  %s78_s9 = ssub.s32 %s2641_s12, %s2643_s15 }
  0x26   : > { %s2129_s8 = sadd.s32 2, %s1286_s13  ;;  %s79_s29 = sor.u32 %s78_s9, %s2118_s14 }
  0x27   : > { %p2134_p9 = por %p89_p7, %p2557_p1  ;;  %p80_p10 = scmp.eq.s32.totalorder %s79_s29, 0 }
  0x28   : > { %p2140_p11 = por %p95_p8, %p2558_p2  ;;  %p2556_p13 = scmp.lt.s32.totalorder %s1981_s6, 4 }
  0x29   : > { %s2146_s21 = scalar_select %p80_p10, %s1949_s23, %s82_s17  }
  0x2a   : > { %s2579_s5 = scalar_select %p2140_p11, 1, 0 }
  0x2b   : > { %s2150_s13 = sshll.u32 %s1977_s30, 2  ;;  %s264_s9 = sand.u32 1, %s1981_s6  }
  0x2c   : > { %2580 = sst [smem:[#allocation26_spill]] %s2579_s5  ;;  %s251_s15 = sadd.s32 %s2150_s13, %s2110_s11 }
  0x2d   : > { %s266_s28 = sand.u32 1, %s1949_s23   ;;  %s277_s4 = sadd.s32 %s2150_s13, %s2641_s12 }
  0x2e   : > { %s1297_s27 = sshll.u32 %s266_s28, 3  ;;  %s1301_s22 = sshll.u32 %s277_s4, 7 }
  0x2f   : > { %s2581_s1 = sld [smem:[#allocation29_spill]]  ;;  %s268_s18 = scalar_lea.vmem [#allocation5], %s1297_s27 }
  0x30   : > { %s281_s5 = sshll.u32 %s268_s18, 4  ;;  %p2164_p0 = pnand %p2556_p13, %p2134_p9  ;;  %s282_s5 = int_to_ptr.vmem [resolvable:$true] %s281_s5 }
  0x31   : > { %s2168_s30 = scalar_lea.sflag [#allocation6], %s264_s9  ;;  %s1728_s28 = scalar_lea.vmem %s282_s5, 128 }
  0x32   : > { %p1717_p3 = pneg %p2164_p0  ;;  %p1729_p4 = scmp.ne.s32.totalorder %s282_s5, %s1728_s28 }
  0x33   : > { %s1983_s2 = smov [#allocation5]  }
  0x34   : > { %p1731_p5 = pnand %p1729_p4, %p1717_p3  ;;  %s1733_s4 = sshll.u32 %s1983_s2, 4  ;;  %s1734_s4 = int_to_ptr.vmem [resolvable:$false] %s1733_s4 }
  0x35   : > { %s279_s14 = scalar_lea.hbm %s2581_s1, %s1301_s22  ;;  %s1735_s18 = scalar_lea.vmem %s1734_s4, 256 }
  0x36   : > { %p1732_p7 = pneg %p1731_p5  ;;  %p1736_p8 = scmp.lt.s32.totalorder %s282_s5, %s1734_s4 }
  0x37   : > { %p1737_p10 = scmp.lt.s32.totalorder %s1735_s18, %s1728_s28 }
  0x39   : > { %p1738_p9 = por %p1737_p10, %p1736_p8 }
  0x3b   : > { %p1739_p12 = pnand %p1738_p9, %p1732_p7 }
  0x3d   : > { %1742 = shalt.err (!%p1739_p12)
}
  0x3e   : > { %1489 = dma.hbm_to_vmem [thread:$0]  (!%p2164_p0), %s279_s14, 128, %s282_s5, %s2168_s30  }
  0x3f   : > { %p1290_p13 = scmp.ge.s32.totalorder %s1981_s6, 1  ;;  %p212_p3 = scmp.lt.s32.totalorder %s1981_s6, 5 }
  0x40   : > { %s1984_s27 = smov [#allocation8]   ;;  %s1283_s9 = sadd.s32 4294967294, %s1981_s6  }
  0x41   : > { %p2177_p4 = pnand %p1290_p13, %p212_p3  ;;  %s224_s12 = sshll.u32 %s1984_s27, 4  ;;  %s225_s12 = int_to_ptr.vmem [resolvable:$true] %s224_s12 }
  0x42   : > { %s1754_s5 = scalar_lea.vmem %s225_s12, 7168  ;;  %p1762_p10 = scmp.lt.s32.totalorder %s225_s12, %s225_s12 }
  0x43   : > { %p1479_p12 = pneg %p2177_p4  ;;  %p1755_p13 = scmp.ne.s32.totalorder %s225_s12, %s1754_s5 }
  0x44   : > { %p1763_p9 = scmp.lt.s32.totalorder %s1754_s5, %s1754_s5 }
  0x45   : > { %p2185_p5 = pnand %p1479_p12, %p2558_p2 }
  0x46   : > { %p1764_p3 = por %p1763_p9, %p1762_p10 }
  0x47   : > { %p1745_p0 = pneg %p2185_p5 }
  0x49   : > { %p1757_p7 = pnand %p1755_p13, %p1745_p0 }
  0x4b   : > { %p1758_p8 = pneg %p1757_p7 }
  0x4d   : > { %p1765_p1 = pnand %p1764_p3, %p1758_p8 }
  0x4f   : > { %1768 = shalt.err (!%p1765_p1)
}
  0x50   : > { %s1985_s14 = smov 448   ;;  %s1986_s29 = smov 28  }
  0x51   : > { %s2585_s3 = sld [smem:[#allocation31_spill]]  ;;  %s46_s2 = sadd.s32 1, %s1961_s26 }
  0x52   : > { %p53_p1 = scmp.ne.s32.totalorder %s1961_s26, %s1957_s25  ;;  %p2587_p12 = scmp.eq.s32.totalorder %s1981_s6, 0 }
  0x53   : > { %s2203_s4 = scalar_select %p44_p6, %s1961_s26, %s46_s2  }
  0x54   : > { %p2207_p0 = por %p2587_p12, %p53_p1  ;;  %p59_p13 = scmp.ne.s32.totalorder %s1957_s25, %s1953_s24 }
  0x55   : > { %2586 = sst [smem:[#allocation27_spill]] %s2203_s4  ;;  %p199_p7 = scmp.eq.s32.totalorder %s2098_s7, 3 }
  0x56   : > { %p205_p8 = scmp.eq.s32.totalorder %s1283_s9, 3  ;;  %p2216_p10 = por %p2558_p2, %p59_p13 }
  0x57   : > { %1482 = dma.hbm_to_vmem [thread:$0]  (!%p2185_p5), %s2585_s3, 7168, %s225_s12, [#allocation9], %s1985_s14, %s1985_s14, %s1986_s29  }
  0x58   : > { %s241_s12 = sand.u32 1, %s1961_s26   ;;  %p2221_p5 = por %p199_p7, %p53_p1 }
  0x59   : > { %p2225_p6 = por %p205_p8, %p59_p13  ;;  %s1293_s5 = sshll.u32 %s241_s12, 4 }
  0x5a   : > { %s2590_s16 = scalar_select %p2221_p5, 1, 0 }
  0x5b   : > { %s2591_s10 = scalar_select %p2225_p6, 1, 0 }
  0x5c   : > { %s1296_s14 = sshll.u32 %s251_s15, 7  ;;  %s2592_s0 = sld [smem:[#allocation28_spill]] }
  0x5d   : > { %s245_s28 = scalar_lea.vmem [#allocation2], %s1293_s5  ;;  %p2593_p9 = scmp.lt.s32.totalorder %s1981_s6, 4 }
  0x5e   : > { %s254_s2 = sshll.u32 %s245_s28, 4  ;;  %s242_s3 = scalar_lea.sflag [#allocation3], %s241_s12  ;;  %s255_s2 = int_to_ptr.vmem [resolvable:$true] %s254_s2 }
  0x5f   : > { %p2239_p3 = pnand %p2593_p9, %p2207_p0  ;;  %s1782_s4 = scalar_lea.vmem %s255_s2, 256 }
  0x60   : > { %p1783_p12 = scmp.ne.s32.totalorder %s255_s2, %s1782_s4  ;;  %s1987_s15 = smov [#allocation2]  }
  0x61   : > { %p1771_p1 = pneg %p2239_p3  ;;  %s1787_s29 = sshll.u32 %s1987_s15, 4  ;;  %s1788_s29 = int_to_ptr.vmem [resolvable:$false] %s1787_s29 }
  0x62   : > { %s253_s9 = scalar_lea.hbm %s2592_s0, %s1296_s14  ;;  %s1789_s5 = scalar_lea.vmem %s1788_s29, 512 }
  0x63   : > { %p1785_p13 = pnand %p1783_p12, %p1771_p1  ;;  %p1790_p8 = scmp.lt.s32.totalorder %s255_s2, %s1788_s29 }
  0x64   : > { %p1791_p2 = scmp.lt.s32.totalorder %s1789_s5, %s1782_s4 }
  0x65   : > { %p1786_p7 = pneg %p1785_p13 }
  0x66   : > { %p1792_p6 = por %p1791_p2, %p1790_p8 }
  0x68   : > { %p1793_p5 = pnand %p1792_p6, %p1786_p7 }
  0x6a   : > { %1796 = shalt.err (!%p1793_p5)
}
  0x6b   : > { %s1988_s18 = smov 128   ;;  %s2595_s12 = sld [smem:[#allocation16_spill]] }
  0x6c   : > { %s2596_s14 = sld [smem:[#allocation25_spill]]  ;;  %s1989_s17 = smov 8  }
  0x6d   : > { %1486 = dma.hbm_to_vmem [thread:$0]  (!%p2239_p3), %s253_s9, 256, %s255_s2, %s242_s3, %s1988_s18, %s1988_s18, %s1989_s17  }
  0x6e   : > { %s1375_s4 = sadd.s32 2, %s2110_s11  ;;  %s118_s28 = sadd.s32 1, %s1937_s20 }
  0x6f   : > { %p107_p2 = scmp.lt.s32.totalorder %s1375_s4, 3  ;;  %p2597_p0 = scmp.lt.s32.totalorder %s2129_s8, 3 }
  0x70   : > { %p125_p5 = scmp.ne.s32.totalorder %s1937_s20, %s1933_s19  ;;  %s290_s29 = sand.u32 1, %s1937_s20  }
  0x71   : > { %s2645_s8 = smov (!%p2597_p0, %s2129_s8), 3  ;;  %s2647_s4 = smov (!%p107_p2, %s1375_s4), 3 }
  0x72   : > { %p131_p6 = scmp.ne.s32.totalorder %s1933_s19, %s2595_s12  ;;  %s114_s15 = ssub.s32 %s2647_s4, %s2645_s8 }
  0x73   : > { %s115_s5 = sor.u32 %s114_s15, %s2596_s14  ;;  %p2598_p9 = scmp.eq.s32.totalorder %s1981_s6, 0 }
  0x74   : > { %p116_p12 = scmp.eq.s32.totalorder %s115_s5, 0  ;;  %p2599_p13 = scmp.eq.s32.totalorder %s2098_s7, 0 }
  0x75   : > { %p127_p1 = por %p125_p5, %p2598_p9  ;;  %s1302_s3 = sshll.u32 %s290_s29, 3 }
  0x76   : > { %p2262_p7 = por %p131_p6, %p2599_p13  ;;  %s301_s11 = sadd.s32 %s2150_s13, %s2647_s4 }
  0x77   : > { %s2268_s9 = scalar_select %p116_p12, %s1937_s20, %s118_s28  }
  0x78   : > { %s2600_s1 = scalar_select %p2262_p7, 1, 0 }
  0x79   : > { %s1305_s2 = sshll.u32 %s301_s11, 7  ;;  %s2601_s0 = sld [smem:[#allocation30_spill]] }
  0x7a   : > { %s292_s8 = scalar_lea.vmem [#allocation7], %s1302_s3  ;;  %p2602_p3 = scmp.lt.s32.totalorder %s1981_s6, 4 }
  0x7b   : > { %s305_s26 = sshll.u32 %s292_s8, 4  ;;  %s1990_s13 = smov [#allocation7]   ;;  %s306_s26 = int_to_ptr.vmem [resolvable:$true] %s305_s26 }
  0x7c   : > { %p2275_p8 = pnand %p2602_p3, %p127_p1  ;;  %s1810_s15 = scalar_lea.vmem %s306_s26, 128 }
  0x7d   : > { %p1811_p0 = scmp.ne.s32.totalorder %s306_s26, %s1810_s15  ;;  %s1815_s4 = sshll.u32 %s1990_s13, 4  ;;  %s1816_s4 = int_to_ptr.vmem [resolvable:$false] %s1815_s4 }
  0x7e   : > { %p1799_p2 = pneg %p2275_p8  ;;  %s1817_s28 = scalar_lea.vmem %s1816_s4, 256 }
  0x7f   : > { %s303_s12 = scalar_lea.hbm %s2601_s0, %s1305_s2  ;;  %p1818_p9 = scmp.lt.s32.totalorder %s306_s26, %s1816_s4 }
  0x80   : > { %p1813_p5 = pnand %p1811_p0, %p1799_p2  ;;  %p1819_p12 = scmp.lt.s32.totalorder %s1817_s28, %s1810_s15 }
  0x82   : > { %p1814_p6 = pneg %p1813_p5  ;;  %p1820_p13 = por %p1819_p12, %p1818_p9 }
  0x84   : > { %p1821_p7 = pnand %p1820_p13, %p1814_p6 }
  0x86   : > { %1824 = shalt.err (!%p1821_p7)
}
  0x87   : > { %1492 = dma.hbm_to_vmem [thread:$0]  (!%p2275_p8), %s303_s12, 128, %s306_s26, %s2168_s30  }
  0x88   : > { %314 = sbr.rel (%p2177_p4) target bundleno = 497 (0x1f1), region = 40  ;;  %s2287_s0 = sand.u32 (!%p2177_p4), 1, %s1957_s25  }
  0x89   : > { %s1307_s29 = sshll.u32 (!%p2177_p4), %s2287_s0, 4  ;;  %s317_s5 = scalar_lea.sflag (!%p2177_p4), [#allocation3], %s2287_s0 }
  0x8a   : > { %s2293_s3 = scalar_lea.vmem (!%p2177_p4), [#allocation2], %s1307_s29 }
  0x8d   : > { %1908 = dma.done.wait (%p2216_p10), %s317_s5, 256  }
  0x8e   : > { %1910 = vsyncadd (%p2216_p10), %s317_s5, 4294967040  ;;  %s2604_s26 = sld [smem:[#allocation17_spill]]  ;;  %s325_s22 = sand.u32 1, %s2098_s7  }
  0x8f   : > { %s326_s18 = scalar_lea.sflag [#allocation6], %s325_s22 }
  0x94   : > { %s327_s11 = sand.u32 1, %s2604_s26  }
  0x95   : > { %s2301_s2 = sshll.u32 %s327_s11, 3 }
  0x96   : > { %s329_s17 = scalar_lea.vmem [#allocation5], %s2301_s2 }
  0x97   : > { %1912 = dma.done.wait (%p2140_p11), %s326_s18, 128  }
  0x98   : > { %1914 = vsyncadd (%p2140_p11), %s326_s18, 4294967168  ;;  %s336_s12 = sand.u32 1, %s1933_s19   ;;  %p2606_p4 = scmp.ne.s32.totalorder %s2600_s1, 0 }
  0x99   : > { %s2309_s27 = sshll.u32 %s336_s12, 3 }
  0x9a   : > { %s338_s8 = scalar_lea.vmem [#allocation7], %s2309_s27 }
  0x9b   : > { %1916 = dma.done.wait (%p2606_p4), %s326_s18, 128  }
  0x9c   : > { %1918 = vsyncadd (%p2606_p4), %s326_s18, 4294967168  ;;  %p2607_p10 = scmp.eq.s32.totalorder %s2098_s7, 0 }
  0x9e   : > { %1920 = dma.done.wait (%p2607_p10), [#allocation9], 7168   ;;  %p2608_p1 = pmov %p2607_p10 }
  0x9f   : > { %v1991_v0 = vmov 0   ;;  %v2322_v1 = vld [vmem:[#allocation8 + $0x18c] ss:$28 sps:$4 sm:$0xff]   ;;  %v1625_v2 = vld [vmem:[#allocation8 + $0x194] ss:$28 sps:$4 sm:$0xff]   ;;  %v1992_v39 = vmov 0.0  }
  0xa0   : > { %1922 = vsyncadd (%p2608_p1), [#allocation9], 4294960128  ;;  %778 = vmatprep.mubr.bf16.mxu0 %v1991_v0  ;;  %820 = vmatprep.mubr.bf16.mxu1 %v1991_v0  ;;  %v1627_v3 = vld [vmem:[#allocation8 + $0x188] ss:$28 sps:$4 sm:$0xff]   ;;  %v2325_v4 = vld [vmem:[#allocation8 + $0x190] ss:$28 sps:$4 sm:$0xff]  }
  0xa1   : > { %746 = vmatprep.subr.bf16.mxu0 %v2322_v1  ;;  %788 = vmatprep.subr.bf16.mxu1 %v1625_v2  ;;  %v2327_v5 = vld [vmem:[#allocation8 + $0x154] ss:$28 sps:$4 sm:$0xff]   ;;  %v1631_v6 = vld [vmem:[#allocation8 + $0x15c] ss:$28 sps:$4 sm:$0xff]   ;;  %v1637_v10 = vld [vmem:[#allocation8 + $0x124] ss:$28 sps:$4 sm:$0xff]  }
  0xa2   : > { %747 = vmatpush1.bf16.msra.mxu0 %v1627_v3  ;;  %789 = vmatpush1.bf16.msra.mxu1 %v2325_v4  ;;  %v1633_v7 = vld [vmem:[#allocation8 + $0x150] ss:$28 sps:$4 sm:$0xff]   ;;  %v2331_v8 = vld [vmem:[#allocation8 + $0x158] ss:$28 sps:$4 sm:$0xff]   ;;  %v2335_v12 = vld [vmem:[#allocation8 + $0x120] ss:$28 sps:$4 sm:$0xff]  }
  0xa3   : > { %748 = vmatprep.subr.bf16.mxu0 %v2327_v5  ;;  %790 = vmatprep.subr.bf16.mxu1 %v1631_v6  ;;  %v2333_v9 = vld [vmem:[#allocation8 + $0x11c] ss:$28 sps:$4 sm:$0xff]   ;;  %v2338_v13 = vld [vmem:[#allocation8 + $0xe4] ss:$28 sps:$4 sm:$0xff]   ;;  %v1643_v14 = vld [vmem:[#allocation8 + $0xec] ss:$28 sps:$4 sm:$0xff]  }
  0xa4   : > { %v1639_v11 = vld [vmem:[#allocation8 + $0x118] ss:$28 sps:$4 sm:$0xff]   ;;  %v1645_v15 = vld [vmem:[#allocation8 + $0xe0] ss:$28 sps:$4 sm:$0xff]   ;;  %v2342_v16 = vld [vmem:[#allocation8 + $0xe8] ss:$28 sps:$4 sm:$0xff]  }
  0xa5   : > { %v2344_v17 = vld [vmem:[#allocation8 + $0xac] ss:$28 sps:$4 sm:$0xff]   ;;  %v1649_v18 = vld [vmem:[#allocation8 + $0xb4] ss:$28 sps:$4 sm:$0xff]   ;;  %v1655_v22 = vld [vmem:[#allocation8 + $0x7c] ss:$28 sps:$4 sm:$0xff]  }
  0xa6   : > { %749 = vmatpush1.bf16.msra.mxu0 %v1633_v7  ;;  %791 = vmatpush1.bf16.msra.mxu1 %v2331_v8  ;;  %v1651_v19 = vld [vmem:[#allocation8 + $0xa8] ss:$28 sps:$4 sm:$0xff]   ;;  %v2347_v20 = vld [vmem:[#allocation8 + $0xb0] ss:$28 sps:$4 sm:$0xff]   ;;  %v2354_v24 = vld [vmem:[#allocation8 + $0x78] ss:$28 sps:$4 sm:$0xff]  }
  0xa7   : > { %750 = vmatprep.subr.bf16.mxu0 %v2333_v9  ;;  %792 = vmatprep.subr.bf16.mxu1 %v1637_v10  ;;  %v2350_v21 = vld [vmem:[#allocation8 + $0x74] ss:$28 sps:$4 sm:$0xff]   ;;  %v2357_v25 = vld [vmem:[#allocation8 + $0x3c] ss:$28 sps:$4 sm:$0xff]   ;;  %v1661_v26 = vld [vmem:[#allocation8 + $0x44] ss:$28 sps:$4 sm:$0xff]  }
  0xa8   : > { %v1657_v23 = vld [vmem:[#allocation8 + $0x70] ss:$28 sps:$4 sm:$0xff]   ;;  %v1663_v27 = vld [vmem:[#allocation8 + $0x38] ss:$28 sps:$4 sm:$0xff]   ;;  %v2360_v28 = vld [vmem:[#allocation8 + $0x40] ss:$28 sps:$4 sm:$0xff]  }
  0xa9   : > { %v2363_v29 = vld [vmem:[#allocation8 + $0x4] ss:$28 sps:$4 sm:$0xff]   ;;  %v1667_v30 = vld [vmem:[#allocation8 + $0xc] ss:$28 sps:$4 sm:$0xff]   ;;  %v1673_v35 = vld [vmem:[#allocation8 + $0x19c] ss:$28 sps:$4 sm:$0xff]  }
  0xaa   : > { %751 = vmatpush1.bf16.msra.mxu0 %v1639_v11  ;;  %793 = vmatpush1.bf16.msra.mxu1 %v2335_v12  ;;  %v1669_v31 = vld [vmem:[#allocation8] ss:$28 sps:$4 sm:$0xff]   ;;  %v2365_v32 = vld [vmem:[#allocation8 + $0x8] ss:$28 sps:$4 sm:$0xff]   ;;  %v1671_v37 = vld [vmem:[#allocation8 + $0x198] ss:$28 sps:$4 sm:$0xff]   ;;  %v1012_v11 = vlaneseq }
  0xab   : > { %752 = vmatprep.subr.bf16.mxu0 %v2338_v13  ;;  %794 = vmatprep.subr.bf16.mxu1 %v1643_v14  ;;  %v2368_v33 = vld [vmem:[%s2293_s3] sm:$0xff]  ;;  %v2372_v34 = vld [vmem:[%s2293_s3 + $0x8] sm:$0xff]  ;;  %vm1993_vm0 = vmmov 0   ;;  %s2609_s7 = sld [smem:[#allocation19_spill]]  ;;  %s378_s22 = scalar_lea.vmem [#allocation10], %s1307_s29 }
  0xac   : > { %v2377_v36 = vpack.c.bf16 %v2372_v34, %v2368_v33  ;;  %v1674_v38 = vld [vmem:[#allocation8 + $0x1a0] ss:$28 sps:$4 sm:$0xff]   ;;  %v1678_v42 = vld [vmem:[#allocation8 + $0x168] ss:$28 sps:$4 sm:$0xff]   ;;  %v1682_v45 = vld [vmem:[#allocation8 + $0x130] ss:$28 sps:$4 sm:$0xff]  }
  0xad   : > { %v1677_v40 = vld [vmem:[#allocation8 + $0x164] ss:$28 sps:$4 sm:$0xff]   ;;  %v1681_v43 = vld [vmem:[#allocation8 + $0x12c] ss:$28 sps:$4 sm:$0xff]   ;;  %v1685_v46 = vld [vmem:[#allocation8 + $0xf4] ss:$28 sps:$4 sm:$0xff]  }
  0xae   : > { %753 = vmatpush1.bf16.msra.mxu0 %v1645_v15  ;;  %795 = vmatpush1.bf16.msra.mxu1 %v2342_v16  ;;  %v1675_v41 = vld [vmem:[#allocation8 + $0x160] ss:$28 sps:$4 sm:$0xff]   ;;  %v1679_v44 = vld [vmem:[#allocation8 + $0x128] ss:$28 sps:$4 sm:$0xff]   ;;  %v1683_v47 = vld [vmem:[#allocation8 + $0xf0] ss:$28 sps:$4 sm:$0xff]  }
  0xaf   : > { %754 = vmatprep.subr.bf16.mxu0 %v2344_v17  ;;  %796 = vmatprep.subr.bf16.mxu1 %v1649_v18  ;;  %v1686_v48 = vld [vmem:[#allocation8 + $0xf8] ss:$28 sps:$4 sm:$0xff]   ;;  %v1690_v51 = vld [vmem:[#allocation8 + $0xc0] ss:$28 sps:$4 sm:$0xff]   ;;  %v1694_v54 = vld [vmem:[#allocation8 + $0x88] ss:$28 sps:$4 sm:$0xff]  }
  0xb0   : > { %v1689_v49 = vld [vmem:[#allocation8 + $0xbc] ss:$28 sps:$4 sm:$0xff]   ;;  %v1693_v52 = vld [vmem:[#allocation8 + $0x84] ss:$28 sps:$4 sm:$0xff]   ;;  %v1697_v55 = vld [vmem:[#allocation8 + $0x4c] ss:$28 sps:$4 sm:$0xff]  }
  0xb1   : > { %v1687_v50 = vld [vmem:[#allocation8 + $0xb8] ss:$28 sps:$4 sm:$0xff]   ;;  %v1691_v53 = vld [vmem:[#allocation8 + $0x80] ss:$28 sps:$4 sm:$0xff]   ;;  %v1695_v56 = vld [vmem:[#allocation8 + $0x48] ss:$28 sps:$4 sm:$0xff]  }
  0xb2   : > { %755 = vmatpush1.bf16.msra.mxu0 %v1651_v19  ;;  %797 = vmatpush1.bf16.msra.mxu1 %v2347_v20  ;;  %v1698_v57 = vld [vmem:[#allocation8 + $0x50] ss:$28 sps:$4 sm:$0xff]   ;;  %v1702_v60 = vld [vmem:[#allocation8 + $0x18] ss:$28 sps:$4 sm:$0xff]   ;;  %v1013_v14 = vshrl.u32 %v1012_v11, 7  ;;  %p998_p11 = scmp.gt.s32.totalorder %s2609_s7, 0 }
  0xb3   : > { %756 = vmatprep.subr.bf16.mxu0 %v2350_v21  ;;  %798 = vmatprep.subr.bf16.mxu1 %v1655_v22  ;;  %v1701_v58 = vld [vmem:[#allocation8 + $0x14] ss:$28 sps:$4 sm:$0xff]   ;;  %v914_v61 = vld [vmem:[%s329_s17] sm:$0xff]  ;;  %p1003_p7 = scmp.lt.s32.totalorder %s2609_s7, 1  ;;  %s2612_s15 = sld [smem:[#allocation32_spill]] }
  0xb4   : > { %v1699_v59 = vld [vmem:[#allocation8 + $0x10] ss:$28 sps:$4 sm:$0xff]   ;;  %v915_v63 = vpack.c.bf16 %v914_v61, %v914_v61  ;;  %vm1057_vm1 = vcmp.lt.s32.totalorder %v1013_v14, 1  ;;  %vm1070_vm3 = vcmp.lt.s32.totalorder %v1013_v14, 7  ;;  %s999_s13 = scalar_select %p998_p11, 1, 0 }
  0xb5   : > { %v956_v62 = vld [vmem:[%s338_s8] sm:$0xff]  ;;  %s1004_s4 = scalar_select %p1003_p7, 1, 0 }
  0xb6   : > { %757 = vmatpush1.bf16.msra.mxu0 %v1657_v23  ;;  %799 = vmatpush1.bf16.msra.mxu1 %v2354_v24  ;;  %v1033_v23 = vand.u32 7, %v1013_v14  ;;  %s2613_s28 = sld [smem:[#allocation20_spill]]  ;;  %s1369_s5 = sshll.u32 %s2609_s7, 1 }
  0xb7   : > { %758 = vmatprep.subr.bf16.mxu0 %v2357_v25  ;;  %800 = vmatprep.subr.bf16.mxu1 %v1661_v26  ;;  %s1135_s11 = sshll.u32 %s378_s22, 4  ;;  %s2614_s17 = sld [smem:[#allocation33_spill]]  ;;  %s2462_s11 = int_to_ptr.vmem [resolvable:$true] %s1135_s11 }
  0xb8   : > { %vm1053_vm4 = vcmp.ge.s32.totalorder %v1033_v23, 1  ;;  %vm1066_vm6 = vcmp.le.s32.totalorder %v1033_v23, 6  ;;  %s1120_s27 = scalar_lea.sflag [#allocation4], %s2287_s0  ;;  %s1825_s29 = scalar_lea.vmem %s2462_s11, 256 }
  0xb9   : > { %p1826_p3 = scmp.ne.s32.totalorder %s2462_s11, %s1825_s29  ;;  %p2615_p8 = scmp.ne.s32.totalorder %s2590_s16, 0 }
  0xba   : > { %759 = vmatpush1.bf16.msra.mxu0 %v1663_v27  ;;  %801 = vmatpush1.bf16.msra.mxu1 %v2360_v28  ;;  %s1994_s8 = smov [#allocation10]  }
  0xbb   : > { %760 = vmatprep.subr.bf16.mxu0 %v2363_v29  ;;  %802 = vmatprep.subr.bf16.mxu1 %v1667_v30  ;;  %p1827_p2 = pnand %p1826_p3, %p2615_p8  ;;  %s1829_s7 = sshll.u32 %s1994_s8, 4  ;;  %s1830_s7 = int_to_ptr.vmem [resolvable:$false] %s1829_s7 }
  0xbc   : > { %s1370_s3 = sshll.u32 %s2613_s28, 2  ;;  %s1831_s1 = scalar_lea.vmem %s1830_s7, 512 }
  0xbd   : > { %s1132_s26 = sadd.s32 %s1370_s3, %s1369_s5  ;;  %p1828_p0 = pneg %p1827_p2 }
  0xbe   : > { %761 = vmatpush1.bf16.msra.mxu0 %v1669_v31  ;;  %803 = vmatpush1.bf16.msra.mxu1 %v2365_v32  ;;  %s1371_s30 = sshll.u32 %s1132_s26, 7  ;;  %p1832_p5 = scmp.lt.s32.totalorder %s2462_s11, %s1830_s7 }
  0xbf   : > { %830 = vmatprep.subr.bf16.mxu0 %v1673_v35  ;;  %1407 = vmatprep.subr.bf16.mxu1 %v1992_v39  ;;  %s2460_s12 = scalar_lea.hbm %s2614_s17, %s1371_s30  ;;  %p1833_p6 = scmp.lt.s32.totalorder %s1831_s1, %s1825_s29 }
  0xc1   : > { %779 = vmatmul.mubr.bf16.vlgmr.msra.gmra.mxu0 %v2377_v36  ;;  %821 = vmatmul.mubr.bf16.vlgmr.msra.gmra.mxu1 %v2377_v36  ;;  %p1834_p9 = por %p1833_p6, %p1832_p5 }
  0xc2   : > { %831 = vmatpush1.bf16.msra.mxu0 %v1671_v37  ;;  %1408 = vmatpush3.bf16.msra.mxu1 %v1674_v38  ;;  %v1101_v37 = vsub.s32 2, %v1013_v14 }
  0xc3   : > { %832 = vmatprep.subr.bf16.mxu0 %v1677_v40  ;;  %1409 = vmatprep.subr.bf16.mxu1 %v1992_v39  ;;  %p1835_p12 = pnand %p1834_p9, %p1828_p0 }
  0xc4   : > { %862 = vmatprep.mubr.bf16.mxu0 %v1991_v0  ;;  %1423 = vmatprep.mubr.msk.bf16.mxu1 %vm1993_vm0, %v1992_v39  ;;  %v957_v0 = vpack.c.bf16 %v956_v62, %v956_v62 }
  0xc6   : > { %833 = vmatpush1.bf16.msra.mxu0 %v1675_v41  ;;  %1410 = vmatpush3.bf16.msra.mxu1 %v1678_v42 }
  0xc7   : > { %834 = vmatprep.subr.bf16.mxu0 %v1681_v43  ;;  %1411 = vmatprep.subr.bf16.mxu1 %v1992_v39 }
  0xca   : > { %835 = vmatpush1.bf16.msra.mxu0 %v1679_v44  ;;  %1412 = vmatpush3.bf16.msra.mxu1 %v1682_v45 }
  0xcb   : > { %836 = vmatprep.subr.bf16.mxu0 %v1685_v46  ;;  %1413 = vmatprep.subr.bf16.mxu1 %v1992_v39  ;;  %v1000_v46 = vstv %s999_s13 }
  0xcc   : > { %vm1001_vm7 = vcmp.eq.s32.totalorder %v1000_v46, 1 }
  0xce   : > { %837 = vmatpush1.bf16.msra.mxu0 %v1683_v47  ;;  %1414 = vmatpush3.bf16.msra.mxu1 %v1686_v48  ;;  %v1005_v47 = vstv %s1004_s4  ;;  %v1014_v48 = vsub.s32 0, %v1013_v14 }
  0xcf   : > { %838 = vmatprep.subr.bf16.mxu0 %v1689_v49  ;;  %1415 = vmatprep.subr.bf16.mxu1 %v1992_v39  ;;  %vm1006_vm8 = vcmp.eq.s32.totalorder %v1005_v47, 1 }
  0xd2   : > { %839 = vmatpush1.bf16.msra.mxu0 %v1687_v50  ;;  %1416 = vmatpush3.bf16.msra.mxu1 %v1690_v51 }
  0xd3   : > { %840 = vmatprep.subr.bf16.mxu0 %v1693_v52  ;;  %1417 = vmatprep.subr.bf16.mxu1 %v1992_v39 }
  0xd6   : > { %841 = vmatpush1.bf16.msra.mxu0 %v1691_v53  ;;  %1418 = vmatpush3.bf16.msra.mxu1 %v1694_v54 }
  0xd7   : > { %842 = vmatprep.subr.bf16.mxu0 %v1697_v55  ;;  %1419 = vmatprep.subr.bf16.mxu1 %v1992_v39 }
  0xda   : > { %843 = vmatpush1.bf16.msra.mxu0 %v1695_v56  ;;  %1420 = vmatpush3.bf16.msra.mxu1 %v1698_v57 }
  0xdb   : > { %844 = vmatprep.subr.bf16.mxu0 %v1701_v58  ;;  %1421 = vmatprep.subr.bf16.mxu1 %v1992_v39 }
  0xde   : > { %845 = vmatpush1.bf16.msra.mxu0 %v1699_v59  ;;  %1422 = vmatpush3.bf16.msra.mxu1 %v1702_v60 }
  0xdf   : > { %1427 = vmatprep.subr.bf16.mxu0 %v1992_v39  ;;  %1447 = vmatprep.subr.bf16.mxu1 %v1992_v39 }
  0xe1   : > { %863 = vmatmul.mubr.bf16.vlgmr.msra.gmra.mxu0 %v2377_v36  ;;  %1424 = vmatmul.mubr.bf16.vlgmr.msra.gmra.mxu1 %v2377_v36 }
  0xe2   : > { %1428 = vmatpush3.bf16.msra.mxu0 %v2322_v1  ;;  %1448 = vmatpush3.bf16.msra.mxu1 %v2325_v4 }
  0xe3   : > { %1429 = vmatprep.subr.bf16.mxu0 %v1992_v39  ;;  %1449 = vmatprep.subr.bf16.mxu1 %v1992_v39 }
  0xe4   : > { %1443 = vmatprep.mubr.msk.bf16.mxu0 %vm1993_vm0, %v1992_v39  ;;  %1463 = vmatprep.mubr.msk.bf16.mxu1 %vm1993_vm0, %v1992_v39 }
  0xe6   : > { %1430 = vmatpush3.bf16.msra.mxu0 %v2327_v5  ;;  %1450 = vmatpush3.bf16.msra.mxu1 %v2331_v8 }
  0xe7   : > { %1431 = vmatprep.subr.bf16.mxu0 %v1992_v39  ;;  %1451 = vmatprep.subr.bf16.mxu1 %v1992_v39 }
  0xea   : > { %1432 = vmatpush3.bf16.msra.mxu0 %v2333_v9  ;;  %1452 = vmatpush3.bf16.msra.mxu1 %v2335_v12 }
  0xeb   : > { %1433 = vmatprep.subr.bf16.mxu0 %v1992_v39  ;;  %1453 = vmatprep.subr.bf16.mxu1 %v1992_v39 }
  0xee   : > { %1434 = vmatpush3.bf16.msra.mxu0 %v2338_v13  ;;  %1454 = vmatpush3.bf16.msra.mxu1 %v2342_v16  ;;  %v1028_v16 = vadd.s32 8, %v1013_v14 }
  0xef   : > { %1435 = vmatprep.subr.bf16.mxu0 %v1992_v39  ;;  %1455 = vmatprep.subr.bf16.mxu1 %v1992_v39 }
  0xf0   : > { %v1040_v19 = vand.u32 7, %v1028_v16 }
  0xf2   : > { %1436 = vmatpush3.bf16.msra.mxu0 %v2344_v17  ;;  %1456 = vmatpush3.bf16.msra.mxu1 %v2347_v20  ;;  %vm1054_vm2 = vcmp.ge.s32.totalorder %v1040_v19, 1  ;;  %vm2439_vm5 = vcmp.le.s32.totalorder %v1040_v19, 6 }
  0xf3   : > { %1437 = vmatprep.subr.bf16.mxu0 %v1992_v39  ;;  %1457 = vmatprep.subr.bf16.mxu1 %v1992_v39 }
  0xf6   : > { %1438 = vmatpush3.bf16.msra.mxu0 %v2350_v21  ;;  %1458 = vmatpush3.bf16.msra.mxu1 %v2354_v24 }
  0xf7   : > { %1439 = vmatprep.subr.bf16.mxu0 %v1992_v39  ;;  %1459 = vmatprep.subr.bf16.mxu1 %v1992_v39 }
  0xfa   : > { %1440 = vmatpush3.bf16.msra.mxu0 %v2357_v25  ;;  %1460 = vmatpush3.bf16.msra.mxu1 %v2360_v28 }
  0xfb   : > { %1441 = vmatprep.subr.bf16.mxu0 %v1992_v39  ;;  %1461 = vmatprep.subr.bf16.mxu1 %v1992_v39  ;;  %v457_v39 = vld [vmem:[%s2612_s15] sm:$0x7] }
  0xfc   : > { %v1102_v44 = vrot.slane %v457_v39, %v1101_v37  ;;  %v1015_v54 = vrot.slane %v457_v39, %v1014_v48 }
  0xfe   : > { %1442 = vmatpush3.bf16.msra.mxu0 %v2363_v29  ;;  %1462 = vmatpush3.bf16.msra.mxu1 %v2365_v32  ;;  %v1085_v32 = vsub.s32 1, %v1013_v14 }
 0x100   : > { %v1086_v42 = vrot.slane %v457_v39, %v1085_v32 }
 0x101   : > { %1444 = vmatmul.mubr.bf16.vlgmr.msra.gmra.mxu0 %v915_v63  ;;  %1464 = vmatmul.mubr.bf16.vlgmr.msra.gmra.mxu1 %v957_v0 }
 0x181   : > { %v2435_v1 = vpop.f32.mrf.mxu0  ;;  %v822_v2 = vpop.f32.mrf.mxu1 }
 0x183   : > { %v782_v3 = vpop.f32.mrf.mxu0  ;;  %v823_v6 = vpop.f32.mrf.mxu1 }
 0x185   : > { %v784_v4 = vpop.f32.mrf.mxu0  ;;  %v2437_v7 = vpop.f32.mrf.mxu1 }
 0x186   : > { %v1009_v53 = vadd.f32 %v784_v4, %v782_v3 }
 0x187   : > { %v786_v5 = vpop.f32.mrf.mxu0  ;;  %v827_v8 = vpop.f32.mrf.mxu1 }
 0x1a1   : > { %v864_v9 = vpop.f32.mrf.mxu0  ;;  %v907_v10 = vpop.f32.mrf.mxu1 }
 0x1a2   : > { %v1055_v22 = vrot.slane %v864_v9, 7  ;;  %v1103_v52 = vadd.f32 %v1102_v44, %v907_v10 }
 0x1a3   : > { %v1425_v12 = vpop.f32.mrf.mxu1  ;;  %v866_v13 = vpop.f32.mrf.mxu0 }
 0x1a4   : > { %v1068_v26 = vrot.slane %v866_v13, 1  ;;  %v1105_v5 = vmul.f32 0.5, %v1103_v52 }
 0x1a5   : > { %v910_v15 = vpop.f32.mrf.mxu1  ;;  %v868_v18 = vpop.f32.mrf.mxu0 }
 0x1a6   : > { %v1056_v20 = vrot.slane %v868_v18, 7  ;;  %v1104_v50 = vadd.f32 %v1102_v44, %v910_v15 }
 0x1a7   : > { %v1426_v17 = vpop.f32.mrf.mxu1  ;;  %v870_v21 = vpop.f32.mrf.mxu0 }
 0x1a8   : > { %v1058_v24 = vsel %vm1057_vm1, %v1055_v22, %v1056_v20  ;;  %v1069_v25 = vrot.slane %v870_v21, 1  ;;  %v1059_v27 = vsel %vm1057_vm1, %v1056_v20, %v1055_v22  ;;  %v1106_v58 = vmul.f32 0.5, %v1104_v50 }
 0x1a9   : > { %v1065_v28 = vsel %vm1054_vm2, %v1058_v24, 0.0  ;;  %v1064_v31 = vsel %vm1053_vm4, %v1059_v27, 0.0 }
 0x1aa   : > { %v1072_v30 = vsel %vm1070_vm3, %v1069_v25, %v1068_v26  ;;  %v1080_v35 = vadd.f32 %v1065_v28, %v827_v8  ;;  %v1071_v36 = vsel %vm1070_vm3, %v1068_v26, %v1069_v25  ;;  %v1079_v40 = vadd.f32 %v1064_v31, %v823_v6 }
 0x1ab   : > { %v1078_v38 = vsel %vm2439_vm5, %v1072_v30, 0.0  ;;  %v1077_v41 = vsel %vm1066_vm6, %v1071_v36, 0.0 }
 0x1ac   : > { %v1082_v43 = vadd.f32 %v1080_v35, %v1078_v38  ;;  %v1081_v45 = vadd.f32 %v1079_v40, %v1077_v41 }
 0x1ae   : > { %v1088_v49 = vadd.f32 %v1086_v42, %v1082_v43  ;;  %v1087_v51 = vadd.f32 %v1086_v42, %v1081_v45 }
 0x1b0   : > { %v1090_v55 = vmul.f32 0.5, %v1088_v49  ;;  %v1089_v61 = vmul.f32 0.5, %v1087_v51 }
 0x1b2   : > { %1703 = vtanh.f32 %v1090_v55 }
 0x1b3   : > { %1705 = vtanh.f32 %v1106_v58 }
 0x1b4   : > { %1707 = vtanh.f32 %v1089_v61 }
 0x1b5   : > { %1709 = vtanh.f32 %v1105_v5 }
 0x1bf   : > { %v1704_v13 = vpop.eup %1703 }
 0x1c0   : > { %v1706_v14 = vpop.eup %1705 }
 0x1c1   : > { %v950_v56 = vpop.f32.mrf.mxu0  ;;  %v992_v57 = vpop.f32.mrf.mxu1  ;;  %v1110_v18 = vmul.f32 0.5, %v1706_v14 }
 0x1c2   : > { %v1002_v59 = vsel %vm1001_vm7, %v950_v56, 0.0  ;;  %v1007_v60 = vsel %vm1006_vm8, %v992_v57, 0.0  ;;  %v1708_v15 = vpop.eup %1707 }
 0x1c3   : > { %v1008_v62 = vadd.f32 %v1002_v59, %v2435_v1  ;;  %v1011_v63 = vadd.f32 %v1009_v53, %v1007_v60  ;;  %v1445_v0 = vpop.f32.mrf.mxu0  ;;  %v1465_v2 = vpop.f32.mrf.mxu1  ;;  %v1093_v19 = vmul.f32 0.5, %v1708_v15  ;;  %v1112_v26 = vadd.f32 0.5, %v1110_v18 }
 0x1c4   : > { %v1710_v16 = vpop.eup %1709 }
 0x1c5   : > { %v1010_v6 = vadd.f32 %v1008_v62, %v2437_v7  ;;  %v1017_v8 = vadd.f32 %v1015_v54, %v1011_v63  ;;  %v953_v9 = vpop.f32.mrf.mxu0  ;;  %v995_v3 = vpop.f32.mrf.mxu1  ;;  %v1094_v7 = vmul.f32 0.5, %v1704_v13  ;;  %v1109_v22 = vmul.f32 0.5, %v1710_v16 }
 0x1c6   : > { %v1095_v27 = vadd.f32 0.5, %v1093_v19 }
 0x1c7   : > { %v1016_v4 = vadd.f32 %v1015_v54, %v1010_v6  ;;  %v1019_v10 = vmul.f32 0.5, %v1017_v8  ;;  %v1446_v11 = vpop.f32.mrf.mxu0  ;;  %v1466_v12 = vpop.f32.mrf.mxu1  ;;  %v1096_v25 = vadd.f32 0.5, %v1094_v7  ;;  %v1111_v30 = vadd.f32 0.5, %v1109_v22 }
 0x1c9   : > { %v1018_v1 = vmul.f32 0.5, %v1016_v4  ;;  %1711 = vtanh.f32 %v1019_v10 }
 0x1cb   : > { %1713 = vtanh.f32 %v1018_v1 }
 0x1d6   : > { %v1712_v17 = vpop.eup %1711 }
 0x1d7   : > { %v1023_v20 = vmul.f32 0.5, %v1712_v17 }
 0x1d8   : > { %v1714_v21 = vpop.eup %1713 }
 0x1d9   : > { %v1022_v23 = vmul.f32 0.5, %v1714_v21  ;;  %v1025_v24 = vadd.f32 0.5, %v1023_v20 }
 0x1db   : > { %v1024_v28 = vadd.f32 0.5, %v1022_v23  ;;  %v1098_v29 = vadd.f32 %v1096_v25, %v1025_v24 }
 0x1dd   : > { %v1097_v31 = vadd.f32 %v1095_v27, %v1024_v28  ;;  %v1114_v32 = vadd.f32 %v1112_v26, %v1098_v29 }
 0x1df   : > { %v1113_v35 = vadd.f32 %v1111_v30, %v1097_v31  ;;  %v1116_v36 = vmul.f32 %v1114_v32, %v2372_v34 }
 0x1e1   : > { %v1115_v37 = vmul.f32 %v1113_v35, %v2368_v33  ;;  %1118 = vst [vmem:[%s378_s22 + $0x8] sm:$0xff] %v1116_v36 }
 0x1e3   : > { %1117 = vst [vmem:[%s378_s22] sm:$0xff] %v1115_v37 }
 0x1e4   : > { %1838 = shalt.err (!%p1835_p12)
}
 0x1e5   : > { %s1839_s14 = scalar_lea.hbm %s2460_s12, 256  ;;  %s1843_s4 = scalar_lea.hbm %s2614_s17, 1024 }
 0x1e6   : > { %p1840_p13 = scmp.ne.s32.totalorder %s2460_s12, %s1839_s14  ;;  %p1844_p1 = scmp.lt.s32.totalorder %s2460_s12, %s2614_s17 }
 0x1e7   : > { %p1845_p11 = scmp.lt.s32.totalorder %s1843_s4, %s1839_s14 }
 0x1e8   : > { %p1841_p4 = pnand %p1840_p13, %p2615_p8 }
 0x1e9   : > { %p1846_p7 = por %p1845_p11, %p1844_p1 }
 0x1ea   : > { %p1842_p10 = pneg %p1841_p4 }
 0x1ec   : > { %p1847_p3 = pnand %p1846_p7, %p1842_p10 }
 0x1ee   : > { %1850 = shalt.err (!%p1847_p3)
}
 0x1ef   : > { %s1995_s3 = smov 128   ;;  %s1996_s26 = smov 8  }
 0x1f0   : > { %1477 = dma.vmem_to_hbm [thread:$0]  (%p2615_p8), %s2462_s11, 256, %s2460_s12, %s1120_s27, %s1995_s3, %s1995_s3, %s1996_s26  }
 0x1f1 PF: > { %p1500_p2 = scmp.ge.s32.totalorder %s1981_s6, 2  ;;  %s1150_s30 = sand.u32 1, %s1953_s24  }
 0x1f2   : > { %p2616_p0 = scmp.ne.s32.totalorder %s2591_s10, 0  ;;  %s1151_s22 = scalar_lea.sflag [#allocation4], %s1150_s30 }
 0x1f4   : > { %p1494_p5 = pnand %p1500_p2, %p2616_p0 }
 0x1f6   : > { %p1495_p6 = pneg %p1494_p5 }
 0x1f8   : > { %1924 = dma.done.wait (%p1495_p6), %s1151_s22, 256  }
 0x1f9   : > { %1926 = vsyncadd (%p1495_p6), %s1151_s22, 4294967040  ;;  %s25_s6 = sadd.s32 1, %s1981_s6   ;;  %s2618_s16 = sld [smem:[#allocation17_spill]] }
 0x1fa   : > { %p2493_p9 = scmp.ge.s32.totalorder %s25_s6, 6   ;;  %s2619_s0 = smov %s2146_s21 }
 0x1fb   : > { %s2620_s11 = sld [smem:[#allocation18_spill]]  ;;  %s2626_s18 = smov %s1933_s19 }
 0x1fc   : > { %s2621_s26 = sld [smem:[#allocation27_spill]]  ;;  %s2627_s19 = smov %s1937_s20 }
 0x1fd   : > { %s2622_s27 = sld [smem:[#allocation21_spill]]  ;;  %s2628_s20 = smov %s2268_s9 }
 0x1fe   : > { %s2623_s28 = sld [smem:[#allocation22_spill]]  ;;  %s2630_s22 = smov %s1949_s23 }
 0x1ff   : > { %s2624_s29 = sld [smem:[#allocation23_spill]]  ;;  %s2629_s21 = smov %s2618_s16 }
 0x200   : > { %s2625_s30 = sld [smem:[#allocation24_spill]]  ;;  %s2631_s23 = smov %s2619_s0 }
 0x201   : > { %s2632_s24 = smov %s1957_s25  ;;  %s2633_s25 = smov %s2620_s11 }
 0x202   :  { %24 = sbr.rel (!%p2493_p9) target bundleno = 20 (0x14), region = 113 }
 0x207   :  { %1156 = vsyncpa [#allocation3], 1 }
 0x208   :  { %1158 = vsyncpa [#allocation3 + $0x1], 1 }
 0x209   :  { %1159 = vsyncpa [#allocation6], 1 }
 0x20a   :  { %1161 = vsyncpa [#allocation6 + $0x1], 1 }
 0x20b   :  { %1162 = vsyncpa [#allocation9], 1 }
 0x20c   :  { %1163 = vsyncpa [#allocation4], 1 }
 0x20d   :  { %1165 = vsyncpa [#allocation4 + $0x1], 1 }

</bundles_post_ra>
